<compile_context>
chip_gen: v5e
topology: v5e:2x2
jax: 0.10.0
libtpu: 0.0.40
codegen_flags: <defaults>
</compile_context>

<pallas_src>
import functools

import jax
import jax.numpy as jnp
from jax import lax
from jax.experimental import pallas as pl
from jax.experimental.pallas import tpu as pltpu

LANES = 128      # TPU lane width
SUBLANES = 8     # f32 sublanes per vreg


def _round_up(x, m):
    return (x + m - 1) // m * m


def _tpu_config():
    """Per-generation (max tile rows, multi-TensorCore?, vmem_limit_bytes)."""
    kind = ""
    try:
        kind = jax.devices()[0].device_kind.lower()
    except Exception:
        pass
    if "v7" in kind or "7x" in kind:
        # 2 TensorCores, ~3.2 TB/s HBM: big tiles, shard outer axis across TCs.
        return 8192, True, 40 * 1024 * 1024
    if "v6" in kind:
        return 4096, False, 32 * 1024 * 1024
    if "v5p" in kind or "v4" in kind:
        return 4096, True, 32 * 1024 * 1024       # megacore: split outer axis
    if "v5" in kind:                              # v5e / v5 lite
        return 4096, False, 24 * 1024 * 1024
    return 2048, False, 24 * 1024 * 1024          # unknown: conservative


def _partial_sums_kernel(x_ref, t_ref, out_ref, *, tm, chunk, steps, rows,
                         has_ragged, unroll):
    """Accumulate lane-resident partial sums into out_ref (block (1,4,8,128)).

    out_ref[0, 0] : sum of per-element BCE-with-logits terms
    out_ref[0, 1] : sum(sigmoid(x) * t)        (Dice intersection)
    out_ref[0, 2] : sum(sigmoid(x))
    out_ref[0, 3] : sum(t)
    """
    i = pl.program_id(1)                      # inner (reduction) axis
    blk = pl.program_id(0) * steps + i        # global block index

    @pl.when(i == 0)
    def _():
        out_ref[...] = jnp.zeros_like(out_ref)

    def tile_sums(masked):
        n_chunks = tm // chunk

        def fold(v):
            # (chunk,128) -> (8,128): layout-preserving sublane split + VPU adds;
            # the expensive cross-lane reduce stays in the wrapper epilogue.
            return v.reshape(chunk // SUBLANES, SUBLANES, LANES).sum(axis=0)

        def body(j, carry):
            a_bce, a_int, a_sig, a_tgt = carry
            r0 = pl.multiple_of(j * chunk, chunk)
            x = x_ref[pl.ds(r0, chunk), :].astype(jnp.float32)
            t = t_ref[pl.ds(r0, chunk), :].astype(jnp.float32)
            # Stable BCE-with-logits: max(x,0) - x*t + log1p(exp(-|x|))
            e = jnp.exp(-jnp.abs(x))
            bce = jnp.maximum(x, 0.0) - x * t + jnp.log1p(e)
            # sigmoid via tanh: single EUP op, no exact divide / NR iterations.
            s = 0.5 * jnp.tanh(0.5 * x) + 0.5
            if masked:
                # Row-granular validity (no flat-index int32 overflow); only the
                # ragged last block executes this path (gated by pl.when below).
                row = (blk * tm + r0
                       + lax.broadcasted_iota(jnp.int32, (chunk, LANES), 0))
                valid = row < rows
                bce = jnp.where(valid, bce, 0.0)
                s = jnp.where(valid, s, 0.0)
                t = jnp.where(valid, t, 0.0)
            return (a_bce + fold(bce), a_int + fold(s * t),
                    a_sig + fold(s), a_tgt + fold(t))

        zero = jnp.zeros((SUBLANES, LANES), jnp.float32)
        return lax.fori_loop(0, n_chunks, body, (zero, zero, zero, zero),
                             unroll=unroll)

    def accumulate(masked):
        a_bce, a_int, a_sig, a_tgt = tile_sums(masked)
        out_ref[0, 0] += a_bce
        out_ref[0, 1] += a_int
        out_ref[0, 2] += a_sig
        out_ref[0, 3] += a_tgt

    if not has_ragged:
        accumulate(False)                       # hot path: zero mask ops
    else:
        is_full = (blk + 1) * tm <= rows        # all rows of block in-bounds

        @pl.when(is_full)
        def _():
            accumulate(False)

        @pl.when(jnp.logical_not(is_full))
        def _():
            accumulate(True)


def custom_loss(inputs, targets, weights=(0.5, 0.5), smooth=1e-6):
    """weights[0] * BCEWithLogitsLoss(mean) + weights[1] * DiceLoss."""
    assert inputs.shape == targets.shape
    total = int(inputs.size)

    x_flat = inputs.reshape(-1)
    t_flat = targets.reshape(-1)

    # Zero-copy reshape when already (8*128)-aligned; otherwise pad only to the
    # next multiple of 1024 with sentinel values (x=-100 -> bce/sigmoid ~ 0,
    # t=0) so the pad region contributes nothing and needs no in-kernel mask.
    padded_total = _round_up(total, SUBLANES * LANES)
    if padded_total != total:
        pad = padded_total - total
        x_flat = jnp.pad(x_flat, (0, pad), constant_values=-100.0)
        t_flat = jnp.pad(t_flat, (0, pad), constant_values=0.0)
    rows = padded_total // LANES                 # multiple of 8

    x2 = x_flat.reshape(rows, LANES)             # free reshape (contiguous)
    t2 = t_flat.reshape(rows, LANES)

    # Generation-aware tiling.
    tm_cap, multi_tc, vmem_limit = _tpu_config()
    tm = min(tm_cap, _round_up(rows, SUBLANES))               # tile rows (x8)
    chunk = next(c for c in (64, 32, 16, 8) if tm % c == 0)   # strip-mine rows
    blocks = pl.cdiv(rows, tm)
    # Split across the two TensorCores only on multi-TC parts and only when the
    # block count divides evenly (no fully out-of-bounds blocks).
    num_slices = 2 if (multi_tc and blocks >= 2 and blocks % 2 == 0) else 1
    steps = blocks // num_slices
    has_ragged = (rows % tm) != 0
    unroll = min(4, tm // chunk)

    kernel = functools.partial(
        _partial_sums_kernel, tm=tm, chunk=chunk, steps=steps, rows=rows,
        has_ragged=has_ragged, unroll=unroll)

    in_map = lambda c, i: (c * steps + i, 0)
    partials = pl.pallas_call(
        kernel,
        out_shape=jax.ShapeDtypeStruct((num_slices, 4, SUBLANES, LANES),
                                       jnp.float32),
        grid_spec=pltpu.PrefetchScalarGridSpec(
            num_scalar_prefetch=0,
            grid=(num_slices, steps),
            in_specs=[
                pl.BlockSpec((tm, LANES), in_map),
                pl.BlockSpec((tm, LANES), in_map),
            ],
            out_specs=pl.BlockSpec((1, 4, SUBLANES, LANES),
                                   lambda c, i: (c, 0, 0, 0)),
        ),
        compiler_params=pltpu.CompilerParams(
            dimension_semantics=("parallel", "arbitrary"),
            vmem_limit_bytes=vmem_limit,
        ),
    )(x2, t2)

    # Tiny epilogue: reduce the (num_slices, 4, 8, 128) partials to 4 scalars
    # (also merges the per-TensorCore partials) and combine the two losses.
    sums = jnp.sum(partials, axis=(0, 2, 3))
    bce_mean = sums[0] / float(total)
    dice = 1.0 - (2.0 * sums[1] + smooth) / (sums[2] + sums[3] + smooth)
    return weights[0] * bce_mean + weights[1] * dice


def _reference_loss(inputs, targets, weights=(0.5, 0.5), smooth=1e-6):
    x = inputs.astype(jnp.float32)
    t = targets.astype(jnp.float32)
    bce = jnp.mean(jnp.maximum(x, 0.0) - x * t + jnp.log1p(jnp.exp(-jnp.abs(x))))
    s = jax.nn.sigmoid(x)
    inter = jnp.sum(s * t)
    union = jnp.sum(s) + jnp.sum(t)
    dice = 1.0 - (2.0 * inter + smooth) / (union + smooth)
    return weights[0] * bce + weights[1] * dice


if __name__ == "__main__":
    key = jax.random.PRNGKey(0)
    k1, k2, k3, k4 = jax.random.split(key, 4)

    # UNet-style segmentation output: N=2, C=4, H=W=16 (NCHW), f32 (aligned,
    # zero-copy path, no padding, no masking).
    logits = jax.random.normal(k1, (2, 4, 16, 16), dtype=jnp.float32)
    targets = (jax.random.uniform(k2, (2, 4, 16, 16)) > 0.5).astype(jnp.float32)

    loss = jax.block_until_ready(custom_loss(logits, targets))
    ref = _reference_loss(logits, targets)
    assert jnp.allclose(loss, ref, rtol=1e-5, atol=1e-6), (loss, ref)

    # bf16 inputs with a ragged size (exercises the sentinel-padding fallback).
    logits2 = jax.random.normal(k3, (3, 4, 150, 150), dtype=jnp.bfloat16)
    targets2 = (jax.random.uniform(k4, (3, 4, 150, 150)) > 0.5).astype(jnp.bfloat16)

    loss2 = jax.block_until_ready(custom_loss(logits2, targets2))
    ref2 = _reference_loss(logits2, targets2)
    assert jnp.allclose(loss2, ref2, rtol=1e-4, atol=1e-4), (loss2, ref2)

    print("KERNEL_OK")
</pallas_src>

<mosaic_0001>
module attributes {stable_mosaic.version = 11 : i64} {
  func.func @_partial_sums_kernel(%arg0: i32, %arg1: i32, %arg2: memref<16x128xf32, #tpu.memory_space<vmem>>, %arg3: memref<16x128xf32, #tpu.memory_space<vmem>>, %arg4: memref<1x4x8x128xf32, #tpu.memory_space<vmem>>) attributes {dimension_semantics = [#tpu.dimension_semantics<parallel>, #tpu.dimension_semantics<arbitrary>], iteration_bounds = array<i64: 1, 1>, scalar_prefetch = 0 : i64, scratch_operands = 0 : i64, tpu.core_type = #tpu.core_type<tc>, window_params = [{transform_indices = @transform_0, window_bounds = array<i64: 16, 128>}, {transform_indices = @transform_1, window_bounds = array<i64: 16, 128>}, {transform_indices = @transform_2, window_bounds = array<i64: 1, 4, 8, 128>}]} {
    %c0_i32 = arith.constant 0 : i32
    %0 = arith.cmpi eq, %arg1, %c0_i32 : i32
    %1 = arith.extui %0 : i1 to i32
    %c0_i32_0 = arith.constant 0 : i32
    %2 = arith.cmpi ne, %1, %c0_i32_0 : i32
    scf.if %2 {
      %cst_41 = arith.constant 0.000000e+00 : f32
      %64 = vector.broadcast %cst_41 : f32 to vector<1x4x8x128xf32>
      %c0_42 = arith.constant 0 : index
      %c0_43 = arith.constant 0 : index
      %c0_44 = arith.constant 0 : index
      %c0_45 = arith.constant 0 : index
      %65 = vector.load %arg4[%c0_42, %c0_43, %c0_44, %c0_45] : memref<1x4x8x128xf32, #tpu.memory_space<vmem>>, vector<1x4x8x128xf32>
      tpu.vector_store %arg4[%c0_42, %c0_43, %c0_44, %c0_45], %64 {strides = array<i32>} : memref<1x4x8x128xf32, #tpu.memory_space<vmem>>, vector<1x4x8x128xf32>,
    } else {
    }
    %cst = arith.constant 0.000000e+00 : f32
    %3 = vector.broadcast %cst : f32 to vector<8x128xf32>
    %c0_i32_1 = arith.constant 0 : i32
    %c16_i32 = arith.constant 16 : i32
    %4 = arith.muli %c0_i32_1, %c16_i32 : i32
    %5 = tpu.assume_multiple %4, 16 : i32
    %6 = arith.index_cast %5 : i32 to index
    %c0 = arith.constant 0 : index
    %7 = vector.load %arg2[%6, %c0] : memref<16x128xf32, #tpu.memory_space<vmem>>, vector<16x128xf32>
    %8 = arith.index_cast %5 : i32 to index
    %c0_2 = arith.constant 0 : index
    %9 = vector.load %arg3[%8, %c0_2] : memref<16x128xf32, #tpu.memory_space<vmem>>, vector<16x128xf32>
    %10 = math.absf %7 : vector<16x128xf32>
    %cst_3 = arith.constant 0.000000e+00 : f32
    %11 = vector.broadcast %cst_3 : f32 to vector<16x128xf32>
    %12 = arith.subf %11, %10 : vector<16x128xf32>
    %13 = math.exp %12 : vector<16x128xf32>
    %cst_4 = arith.constant 0.000000e+00 : f32
    %14 = vector.broadcast %cst_4 : f32 to vector<16x128xf32>
    %15 = arith.maximumf %7, %14 : vector<16x128xf32>
    %16 = arith.mulf %7, %9 : vector<16x128xf32>
    %17 = arith.subf %15, %16 : vector<16x128xf32>
    %18 = math.log1p %13 : vector<16x128xf32>
    %19 = arith.addf %17, %18 : vector<16x128xf32>
    %cst_5 = arith.constant 5.000000e-01 : f32
    %20 = vector.broadcast %cst_5 : f32 to vector<16x128xf32>
    %21 = arith.mulf %20, %7 : vector<16x128xf32>
    %22 = math.tanh %21 : vector<16x128xf32>
    %cst_6 = arith.constant 5.000000e-01 : f32
    %23 = vector.broadcast %cst_6 : f32 to vector<16x128xf32>
    %24 = arith.mulf %23, %22 : vector<16x128xf32>
    %cst_7 = arith.constant 5.000000e-01 : f32
    %25 = vector.broadcast %cst_7 : f32 to vector<16x128xf32>
    %26 = arith.addf %24, %25 : vector<16x128xf32>
    %27 = vector.shape_cast %19 : vector<16x128xf32> to vector<2x8x128xf32>
    %cst_8 = arith.constant dense<0.000000e+00> : vector<8x128xf32>
    %28 = vector.multi_reduction <add>, %27, %cst_8 [0] : vector<2x8x128xf32> to vector<8x128xf32>
    %29 = arith.addf %3, %28 : vector<8x128xf32>
    %30 = arith.mulf %26, %9 : vector<16x128xf32>
    %31 = vector.shape_cast %30 : vector<16x128xf32> to vector<2x8x128xf32>
    %cst_9 = arith.constant dense<0.000000e+00> : vector<8x128xf32>
    %32 = vector.multi_reduction <add>, %31, %cst_9 [0] : vector<2x8x128xf32> to vector<8x128xf32>
    %33 = arith.addf %3, %32 : vector<8x128xf32>
    %34 = vector.shape_cast %26 : vector<16x128xf32> to vector<2x8x128xf32>
    %cst_10 = arith.constant dense<0.000000e+00> : vector<8x128xf32>
    %35 = vector.multi_reduction <add>, %34, %cst_10 [0] : vector<2x8x128xf32> to vector<8x128xf32>
    %36 = arith.addf %3, %35 : vector<8x128xf32>
    %37 = vector.shape_cast %9 : vector<16x128xf32> to vector<2x8x128xf32>
    %cst_11 = arith.constant dense<0.000000e+00> : vector<8x128xf32>
    %38 = vector.multi_reduction <add>, %37, %cst_11 [0] : vector<2x8x128xf32> to vector<8x128xf32>
    %39 = arith.addf %3, %38 : vector<8x128xf32>
    %c1_i32 = arith.constant 1 : i32
    %c0_12 = arith.constant 0 : index
    %c0_13 = arith.constant 0 : index
    %c0_14 = arith.constant 0 : index
    %c0_15 = arith.constant 0 : index
    %40 = vector.load %arg4[%c0_12, %c0_13, %c0_14, %c0_15] : memref<1x4x8x128xf32, #tpu.memory_space<vmem>>, vector<1x1x8x128xf32>
    %41 = vector.shape_cast %40 : vector<1x1x8x128xf32> to vector<8x128xf32>
    %42 = arith.addf %41, %29 : vector<8x128xf32>
    %c0_16 = arith.constant 0 : index
    %c0_17 = arith.constant 0 : index
    %c0_18 = arith.constant 0 : index
    %c0_19 = arith.constant 0 : index
    %43 = vector.load %arg4[%c0_16, %c0_17, %c0_18, %c0_19] : memref<1x4x8x128xf32, #tpu.memory_space<vmem>>, vector<1x1x8x128xf32>
    %44 = vector.shape_cast %43 : vector<1x1x8x128xf32> to vector<8x128xf32>
    %45 = vector.shape_cast %42 : vector<8x128xf32> to vector<1x1x8x128xf32>
    tpu.vector_store %arg4[%c0_16, %c0_17, %c0_18, %c0_19], %45 {strides = array<i32>} : memref<1x4x8x128xf32, #tpu.memory_space<vmem>>, vector<1x1x8x128xf32>,
    %c0_20 = arith.constant 0 : index
    %c1 = arith.constant 1 : index
    %c0_21 = arith.constant 0 : index
    %c0_22 = arith.constant 0 : index
    %46 = vector.load %arg4[%c0_20, %c1, %c0_21, %c0_22] : memref<1x4x8x128xf32, #tpu.memory_space<vmem>>, vector<1x1x8x128xf32>
    %47 = vector.shape_cast %46 : vector<1x1x8x128xf32> to vector<8x128xf32>
    %48 = arith.addf %47, %33 : vector<8x128xf32>
    %c0_23 = arith.constant 0 : index
    %c1_24 = arith.constant 1 : index
    %c0_25 = arith.constant 0 : index
    %c0_26 = arith.constant 0 : index
    %49 = vector.load %arg4[%c0_23, %c1_24, %c0_25, %c0_26] : memref<1x4x8x128xf32, #tpu.memory_space<vmem>>, vector<1x1x8x128xf32>
    %50 = vector.shape_cast %49 : vector<1x1x8x128xf32> to vector<8x128xf32>
    %51 = vector.shape_cast %48 : vector<8x128xf32> to vector<1x1x8x128xf32>
    tpu.vector_store %arg4[%c0_23, %c1_24, %c0_25, %c0_26], %51 {strides = array<i32>} : memref<1x4x8x128xf32, #tpu.memory_space<vmem>>, vector<1x1x8x128xf32>,
    %c0_27 = arith.constant 0 : index
    %c2 = arith.constant 2 : index
    %c0_28 = arith.constant 0 : index
    %c0_29 = arith.constant 0 : index
    %52 = vector.load %arg4[%c0_27, %c2, %c0_28, %c0_29] : memref<1x4x8x128xf32, #tpu.memory_space<vmem>>, vector<1x1x8x128xf32>
    %53 = vector.shape_cast %52 : vector<1x1x8x128xf32> to vector<8x128xf32>
    %54 = arith.addf %53, %36 : vector<8x128xf32>
    %c0_30 = arith.constant 0 : index
    %c2_31 = arith.constant 2 : index
    %c0_32 = arith.constant 0 : index
    %c0_33 = arith.constant 0 : index
    %55 = vector.load %arg4[%c0_30, %c2_31, %c0_32, %c0_33] : memref<1x4x8x128xf32, #tpu.memory_space<vmem>>, vector<1x1x8x128xf32>
    %56 = vector.shape_cast %55 : vector<1x1x8x128xf32> to vector<8x128xf32>
    %57 = vector.shape_cast %54 : vector<8x128xf32> to vector<1x1x8x128xf32>
    tpu.vector_store %arg4[%c0_30, %c2_31, %c0_32, %c0_33], %57 {strides = array<i32>} : memref<1x4x8x128xf32, #tpu.memory_space<vmem>>, vector<1x1x8x128xf32>,
    %c0_34 = arith.constant 0 : index
    %c3 = arith.constant 3 : index
    %c0_35 = arith.constant 0 : index
    %c0_36 = arith.constant 0 : index
    %58 = vector.load %arg4[%c0_34, %c3, %c0_35, %c0_36] : memref<1x4x8x128xf32, #tpu.memory_space<vmem>>, vector<1x1x8x128xf32>
    %59 = vector.shape_cast %58 : vector<1x1x8x128xf32> to vector<8x128xf32>
    %60 = arith.addf %59, %39 : vector<8x128xf32>
    %c0_37 = arith.constant 0 : index
    %c3_38 = arith.constant 3 : index
    %c0_39 = arith.constant 0 : index
    %c0_40 = arith.constant 0 : index
    %61 = vector.load %arg4[%c0_37, %c3_38, %c0_39, %c0_40] : memref<1x4x8x128xf32, #tpu.memory_space<vmem>>, vector<1x1x8x128xf32>
    %62 = vector.shape_cast %61 : vector<1x1x8x128xf32> to vector<8x128xf32>
    %63 = vector.shape_cast %60 : vector<8x128xf32> to vector<1x1x8x128xf32>
    tpu.vector_store %arg4[%c0_37, %c3_38, %c0_39, %c0_40], %63 {strides = array<i32>} : memref<1x4x8x128xf32, #tpu.memory_space<vmem>>, vector<1x1x8x128xf32>,
    return
  }
  func.func @transform_0(%arg0: i32, %arg1: i32) -> (i32, i32) {
    %c1_i32 = arith.constant 1 : i32
    %0 = arith.muli %arg0, %c1_i32 : i32
    %1 = arith.addi %0, %arg1 : i32
    %c0_i32 = arith.constant 0 : i32
    %c0_i32_0 = arith.constant 0 : i32
    return %1, %c0_i32 : i32, i32
  }
  func.func @transform_1(%arg0: i32, %arg1: i32) -> (i32, i32) {
    %c1_i32 = arith.constant 1 : i32
    %0 = arith.muli %arg0, %c1_i32 : i32
    %1 = arith.addi %0, %arg1 : i32
    %c0_i32 = arith.constant 0 : i32
    %c0_i32_0 = arith.constant 0 : i32
    return %1, %c0_i32 : i32, i32
  }
  func.func @transform_2(%arg0: i32, %arg1: i32) -> (i32, i32, i32, i32) {
    %c0_i32 = arith.constant 0 : i32
    %c0_i32_0 = arith.constant 0 : i32
    %c0_i32_1 = arith.constant 0 : i32
    %c0_i32_2 = arith.constant 0 : i32
    return %arg0, %c0_i32, %c0_i32_0, %c0_i32_1 : i32, i32, i32, i32
  }
}

</mosaic_0001>

<bundles_post_ra>
// kernel: tpu_custom_call.1
= control target key start
LH: loop header
LB: loop body
LE: loop exit
PB: predicated region body
PF: predicated region fallthrough
CT: control target
= control target key end

     0   :  { %7 = vsyncpa [#allocation3], 0  ;;  %s289_s0 = inlined_call_operand.hbm [shape: f32[16,128], index: 0, kind: input, shape index: {}]   ;;  %s290_s1 = inlined_call_operand.hbm [shape: f32[16,128], index: 1, kind: input, shape index: {}]   ;;  %s291_s2 = inlined_call_operand.hbm [shape: f32[1,4,8,128], index: 2, kind: output, shape index: {}]  }
   0x1   :  { %8 = vsyncpa [#allocation6], 0 }
   0x2   :  { %9 = vsyncpa [#allocation4], 0  ;;  %s18_s11 = sshll.u32 %s289_s0, 4  ;;  %s251_s12 = smov [#allocation2]   ;;  %s19_s11 = int_to_ptr.hbm [resolvable:$true] %s18_s11 }
   0x3   :  { %s20_s13 = sshll.u32 %s251_s12, 4  ;;  %s35_s16 = sshll.u32 %s290_s1, 4  ;;  %s21_s13 = int_to_ptr.vmem [resolvable:$true] %s20_s13  ;;  %s36_s16 = int_to_ptr.hbm [resolvable:$true] %s35_s16 }
   0x4   :  { %s252_s17 = smov 128   ;;  %s253_s18 = smov 8  }
   0x5   :  { %26 = dma.hbm_to_vmem [thread:$0]  %s19_s11, 256, %s21_s13, [#allocation3], %s252_s17, %s252_s17, %s253_s18  }
   0x6   :  { %s254_s19 = smov [#allocation5]  }
   0x7   :  { %s37_s20 = sshll.u32 %s254_s19, 4  ;;  %s38_s20 = int_to_ptr.vmem [resolvable:$true] %s37_s20 }
   0x8   :  { %43 = dma.hbm_to_vmem [thread:$0]  %s36_s16, 256, %s38_s20, [#allocation6], %s252_s17, %s252_s17, %s253_s18  }
   0x9   :  { %245 = dma.done.wait [#allocation3], 256  }
   0xa   :  { %246 = vsyncadd [#allocation3], 4294967040 }
   0xb   :  { %247 = dma.done.wait [#allocation6], 256  }
   0xc   :  { %248 = vsyncadd [#allocation6], 4294967040  ;;  %v64_v0 = vld [vmem:[#allocation2] sm:$0xff]  ;;  %v65_v1 = vld [vmem:[#allocation2 + $0x8] sm:$0xff]  ;;  %s255_s0 = smov [#allocation7]   ;;  %s141_s23 = sshll.u32 %s291_s2, 4  ;;  %s142_s23 = int_to_ptr.hbm [resolvable:$true] %s141_s23 }
   0xd   :  { %v68_v2 = vand.u32 2147483647, %v64_v0  ;;  %v69_v3 = vand.u32 2147483647, %v65_v1  ;;  %v66_v4 = vld [vmem:[#allocation5] sm:$0xff]  ;;  %v67_v5 = vld [vmem:[#allocation5 + $0x8] sm:$0xff] }
   0xe   :  { %v102_v6 = vmul.f32 0.5, %v64_v0  ;;  %v103_v7 = vmul.f32 0.5, %v65_v1  ;;  %v118_v10 = vadd.f32 %v67_v5, %v66_v4  ;;  %v76_v27 = vmax.f32 %v64_v0, 0.0  ;;  %s139_s1 = sshll.u32 %s255_s0, 4  ;;  %s140_s1 = int_to_ptr.vmem [resolvable:$true] %s139_s1 }
   0xf   :  { %v70_v8 = vsub.f32 0.0, %v68_v2  ;;  %v71_v9 = vsub.f32 0.0, %v69_v3  ;;  %v78_v30 = vmul.f32 %v66_v4, %v64_v0  ;;  %v77_v34 = vmax.f32 %v65_v1, 0.0 }
  0x10   :  { %161 = vtanh.f32 %v102_v6  ;;  %134 = vst [vmem:[#allocation7 + $0x18] sm:$0xff] %v118_v10  ;;  %v79_v35 = vmul.f32 %v67_v5, %v65_v1 }
  0x11   :  { %v72_v11 = vmul.f32 1.442695, %v70_v8  ;;  %v74_v12 = vmul.f32 1.442695, %v71_v9  ;;  %163 = vtanh.f32 %v103_v7  ;;  %v80_v39 = vsub.f32 %v76_v27, %v78_v30 }
  0x12   :  { %v81_v42 = vsub.f32 %v77_v34, %v79_v35 }
  0x13   :  { %165 = vpow2.f32 %v72_v11 }
  0x14   :  { %167 = vpow2.f32 %v74_v12 }
  0x16   :  { %v162_v13 = vpop.eup %161 }
  0x17   :  { %v164_v14 = vpop.eup %163  ;;  %v106_v15 = vmul.f32 0.5, %v162_v13 }
  0x18   :  { %v107_v16 = vmul.f32 0.5, %v164_v14 }
  0x19   :  { %v166_v17 = vpop.eup %165  ;;  %v108_v18 = vadd.f32 0.5, %v106_v15 }
  0x1a   :  { %v168_v19 = vpop.eup %167  ;;  %v82_v20 = vadd.f32 1.0, %v166_v17  ;;  %v85_v21 = vmul.f32 -0.5, %v166_v17  ;;  %v109_v22 = vadd.f32 0.5, %v107_v16  ;;  %v88_v31 = vand.u32 2147483647, %v166_v17 }
  0x1b   :  { %v91_v23 = vadd.f32 1.0, %v168_v19  ;;  %v94_v24 = vmul.f32 -0.5, %v168_v19  ;;  %v112_v25 = vmul.f32 %v108_v18, %v66_v4  ;;  %v97_v36 = vand.u32 2147483647, %v168_v19 }
  0x1c   :  { %169 = vlog2.f32 %v82_v20  ;;  %v113_v26 = vmul.f32 %v109_v22, %v67_v5  ;;  %v86_v28 = vadd.f32 1.0, %v85_v21  ;;  %v116_v29 = vadd.f32 %v109_v22, %v108_v18 }
  0x1d   :  { %171 = vlog2.f32 %v91_v23  ;;  %v95_v32 = vadd.f32 1.0, %v94_v24  ;;  %vm89_vm0 = vcmp.lt.f32.partialorder %v88_v31, 0.0004427343  ;;  %vm98_vm1 = vcmp.lt.f32.partialorder %v97_v36, 0.0004427343 }
  0x1e   :  { %v114_v33 = vadd.f32 %v113_v26, %v112_v25  ;;  %v87_v37 = vmul.f32 %v166_v17, %v86_v28  ;;  %130 = vst [vmem:[#allocation7 + $0x10] sm:$0xff] %v116_v29 }
  0x1f   :  { %v96_v40 = vmul.f32 %v168_v19, %v95_v32 }
  0x20   :  { %126 = vst [vmem:[#allocation7 + $0x8] sm:$0xff] %v114_v33 }
  0x22   :  { %v170_v38 = vpop.eup %169 }
  0x23   :  { %v172_v41 = vpop.eup %171  ;;  %v84_v43 = vmul.f32 0.6931472, %v170_v38 }
  0x24   :  { %v93_v44 = vmul.f32 0.6931472, %v172_v41 }
  0x25   :  { %v90_v45 = vsel %vm89_vm0, %v87_v37, %v84_v43 }
  0x26   :  { %v99_v46 = vsel %vm98_vm1, %v96_v40, %v93_v44  ;;  %v100_v47 = vadd.f32 %v90_v45, %v80_v39 }
  0x27   :  { %v101_v48 = vadd.f32 %v99_v46, %v81_v42 }
  0x29   :  { %v110_v49 = vadd.f32 %v101_v48, %v100_v47 }
  0x2b   :  { %122 = vst [vmem:[#allocation7] sm:$0xff] %v110_v49 }
  0x2c   :  { %147 = dma.vmem_to_hbm [thread:$0]  %s140_s1, 512, %s142_s23, [#allocation4], %s252_s17, %s252_s17, %s253_s18  }
  0x2d   :  { %249 = dma.done.wait [#allocation4], 512  }
  0x2e   :  { %250 = vsyncadd [#allocation4], 4294966784 }
  0x2f   :  { %152 = vsyncpa [#allocation3], 1 }
  0x30   :  { %153 = vsyncpa [#allocation6], 1 }
  0x31   :  { %154 = vsyncpa [#allocation4], 1 }

</bundles_post_ra>
